<compile_context>
chip_gen: v5e
topology: v5e:2x2
jax: 0.10.0
libtpu: 0.0.40
codegen_flags: <defaults>
</compile_context>

<pallas_src>
import functools

import jax
import jax.numpy as jnp
from jax import lax
from jax.experimental import pallas as pl
from jax.experimental.pallas import tpu as pltpu


# Minimum input bytes streamed per grid step (hide ~0.35us/step overhead).
_MIN_STEP_BYTES = 8 * 1024 * 1024
# Headroom left on top of the accounted block/scratch bytes for Mosaic.
_VMEM_HEADROOM = 4 * 1024 * 1024


def _round_up(x, m):
    return ((x + m - 1) // m) * m


def _round_down(x, m):
    return (x // m) * m


def _chip_config():
    """Return (num_tensorcores, block budget bytes) for the current backend."""
    kind = ""
    try:
        kind = jax.devices()[0].device_kind.lower()
    except Exception:
        pass
    # v5e / v6e expose a single TensorCore per chip (grid = serial loop);
    # v7x (and megacore parts) can shard "parallel" grid axes across 2 cores.
    single_tc = any(t in kind for t in ("v5 lite", "v5e", "v6 lite", "v6e"))
    num_tc = 1 if single_tc else 2

    try:
        vmem_cap = int(pltpu.get_tpu_info().vmem_capacity_bytes)
    except Exception:
        vmem_cap = 64 * 1024 * 1024  # conservative (v7x-sized) fallback
    # ~40% of physical VMEM for the double-buffered DMA blocks:
    # ~44 MiB on 128 MiB parts (v5e/v6e), ~25 MiB on 64 MiB parts (v7x).
    budget = max(16 * 1024 * 1024, min(44 * 1024 * 1024, int(0.4 * vmem_cap)))
    return num_tc, budget


def _pool_rows_kernel(x_ref, o_ref, *, inv_hw):
    """Full spatial extent in one block: single pass, no scratch."""
    x = x_ref[...]                                    # (tile_rows, hw), native dtype
    mx = jnp.max(x, axis=-1, keepdims=True)           # max exact in native dtype
    sm = jnp.sum(x, axis=-1, keepdims=True, dtype=jnp.float32)  # fused f32 accumulate
    o_ref[...] = (mx.astype(jnp.float32) + sm * inv_hw).astype(o_ref.dtype)


def _pool_chunked_kernel(x_ref, o_ref, max_acc, sum_acc, *, hw, tile_hw, mask_hw):
    """Spatial axis tiled: running max / f32-sum accumulators, finalize on last block."""
    k = pl.program_id(1)
    last = pl.num_programs(1) - 1

    @pl.when(k == 0)
    def _():
        max_acc[...] = jnp.full_like(max_acc, -jnp.inf)
        sum_acc[...] = jnp.zeros_like(sum_acc)

    x = x_ref[...]                                    # (tile_rows, tile_hw)

    def _accumulate(x_max, x_sum):
        max_acc[...] = jnp.maximum(
            max_acc[...],
            jnp.max(x_max, axis=-1, keepdims=True).astype(jnp.float32))
        sum_acc[...] = sum_acc[...] + jnp.sum(
            x_sum, axis=-1, keepdims=True, dtype=jnp.float32)

    if mask_hw:
        # Only the final spatial block is ragged; keep every other chunk on the
        # cheap unmasked path (no iota/compare/select per element).
        @pl.when(k != last)
        def _():
            _accumulate(x, x)

        @pl.when(k == last)
        def _():
            col = k * tile_hw + lax.broadcasted_iota(jnp.int32, x.shape, 1)
            valid = col < hw
            _accumulate(jnp.where(valid, x, jnp.array(-jnp.inf, x.dtype)),
                        jnp.where(valid, x, jnp.zeros((), x.dtype)))
    else:
        _accumulate(x, x)

    @pl.when(k == last)
    def _():
        o_ref[...] = (max_acc[...] + sum_acc[...] * (1.0 / hw)).astype(o_ref.dtype)


def combined_pooling(x, _block_budget_bytes=None):
    """Equivalent of CombinedPooling.forward: (N, C, H, W) -> (N, C, 1, 1)."""
    N, C, H, W = x.shape
    rows, hw = N * C, H * W
    itemsize = jnp.dtype(x.dtype).itemsize
    sub = max(8, 32 // itemsize)        # sublane packing: 8 f32 / 16 bf16 / 32 int8

    num_tc, budget = _chip_config()
    if _block_budget_bytes is not None:   # test hook to force the chunked path
        budget = _block_budget_bytes

    x2 = x.reshape(rows, hw)            # no jnp.pad: edge blocks handle ragged rows
    rows_blk = _round_up(rows, sub)
    hw_pad = _round_up(hw, 128)         # lane-padded width for VMEM accounting

    # Per-row VMEM cost on the simple path: double-buffered (lane-padded) input
    # block plus double-buffered (lane-padded) width-1 output block.
    per_row_cost = 2 * hw_pad * itemsize + 2 * 128 * itemsize
    cap_rows = _round_down(budget // per_row_cost, sub)

    if cap_rows >= sub:
        # ---- common path: whole spatial extent per block, tile the rows ----
        if num_tc > 1:
            # ~2 tiles per TensorCore, each step >= _MIN_STEP_BYTES when
            # possible, but never fewer than num_tc tiles.
            min_rows = _round_up(pl.cdiv(_MIN_STEP_BYTES, hw * itemsize), sub)
            want_rows = _round_up(pl.cdiv(rows_blk, 2 * num_tc), sub)
            want_rows = max(want_rows, min_rows)
            want_rows = min(want_rows, _round_up(pl.cdiv(rows_blk, num_tc), sub))
            want_rows = max(want_rows, sub)
        else:
            # Single TC: the grid is a serial loop -> fewest, biggest steps.
            want_rows = cap_rows
        tile_rows = max(sub, min(cap_rows, want_rows, rows_blk))

        grid = (pl.cdiv(rows, tile_rows),)
        kernel = functools.partial(_pool_rows_kernel, inv_hw=float(1.0 / hw))
        in_specs = [pl.BlockSpec((tile_rows, hw), lambda i: (i, 0))]
        out_specs = pl.BlockSpec((tile_rows, 1), lambda i: (i, 0))
        scratch_shapes = []
        dim_sem = ("parallel",)
        vmem_bytes = tile_rows * per_row_cost
    else:
        # ---- huge feature maps: tile the spatial axis too, accumulate ----
        tile_rows = sub
        max_hw = budget // (2 * tile_rows * itemsize)
        tile_hw = min(max(128, _round_down(max_hw, 128)), hw_pad)

        grid = (pl.cdiv(rows, tile_rows), pl.cdiv(hw, tile_hw))
        kernel = functools.partial(_pool_chunked_kernel, hw=hw, tile_hw=tile_hw,
                                   mask_hw=(hw % tile_hw != 0))
        in_specs = [pl.BlockSpec((tile_rows, tile_hw), lambda i, k: (i, k))]
        out_specs = pl.BlockSpec((tile_rows, 1), lambda i, k: (i, 0))
        scratch_shapes = [pltpu.VMEM((tile_rows, 1), jnp.float32),
                          pltpu.VMEM((tile_rows, 1), jnp.float32)]
        dim_sem = ("parallel", "arbitrary")
        vmem_bytes = (2 * tile_rows * tile_hw * itemsize      # input (double buf)
                      + 2 * tile_rows * 128 * itemsize        # output (lane-padded)
                      + 2 * tile_rows * 128 * 4)              # f32 scratch accumulators

    out = pl.pallas_call(
        kernel,
        out_shape=jax.ShapeDtypeStruct((rows, 1), x.dtype),
        grid_spec=pltpu.PrefetchScalarGridSpec(
            num_scalar_prefetch=0,
            grid=grid,
            in_specs=in_specs,
            out_specs=out_specs,
            scratch_shapes=scratch_shapes,
        ),
        compiler_params=pltpu.CompilerParams(
            dimension_semantics=dim_sem,
            vmem_limit_bytes=int(vmem_bytes + _VMEM_HEADROOM),
        ),
    )(x2)

    return out.reshape(N, C, 1, 1)


if __name__ == "__main__":
    key = jax.random.PRNGKey(0)

    def ref_pool(v):
        return (jnp.max(v, axis=(2, 3), keepdims=True)
                + jnp.mean(v, axis=(2, 3), keepdims=True))

    # 1) Common path, aligned shapes.
    x1 = jax.random.normal(key, (2, 4, 16, 16), dtype=jnp.float32)
    y1 = combined_pooling(x1)
    jax.block_until_ready(y1)
    assert y1.shape == (2, 4, 1, 1), y1.shape
    assert jnp.allclose(y1, ref_pool(x1), atol=1e-5, rtol=1e-5), "mismatch (case 1)"

    # 2) Ragged row count (N*C=15) and non-128 spatial extent (7x7):
    #    exercises Pallas edge blocks with no wrapper padding.
    x2 = jax.random.normal(jax.random.PRNGKey(1), (3, 5, 7, 7), dtype=jnp.float32)
    y2 = combined_pooling(x2)
    jax.block_until_ready(y2)
    assert y2.shape == (3, 5, 1, 1), y2.shape
    assert jnp.allclose(y2, ref_pool(x2), atol=1e-5, rtol=1e-5), "mismatch (case 2)"

    # 3) Force the chunked (spatial-tiled) fallback path with a tiny budget;
    #    30x30 also exercises the ragged-last-block masking.
    x3 = jax.random.normal(jax.random.PRNGKey(2), (2, 4, 30, 30), dtype=jnp.float32)
    y3 = combined_pooling(x3, _block_budget_bytes=16 * 1024)
    jax.block_until_ready(y3)
    assert y3.shape == (2, 4, 1, 1), y3.shape
    assert jnp.allclose(y3, ref_pool(x3), atol=1e-5, rtol=1e-5), "mismatch (case 3)"

    print("KERNEL_OK")
</pallas_src>

<mosaic_0001>
module attributes {stable_mosaic.version = 11 : i64} {
  func.func @_pool_rows_kernel(%arg0: i32, %arg1: memref<8x256xf32, #tpu.memory_space<vmem>>, %arg2: memref<8x1xf32, #tpu.memory_space<vmem>>) attributes {dimension_semantics = [#tpu.dimension_semantics<parallel>], iteration_bounds = array<i64: 1>, scalar_prefetch = 0 : i64, scratch_operands = 0 : i64, tpu.core_type = #tpu.core_type<tc>, window_params = [{transform_indices = @transform_0, window_bounds = array<i64: 8, 256>}, {transform_indices = @transform_1, window_bounds = array<i64: 8, 1>}]} {
    %c0 = arith.constant 0 : index
    %c0_0 = arith.constant 0 : index
    %0 = vector.load %arg1[%c0, %c0_0] : memref<8x256xf32, #tpu.memory_space<vmem>>, vector<8x256xf32>
    %cst = arith.constant dense<0xFF800000> : vector<8xf32>
    %1 = vector.multi_reduction <maximumf>, %0, %cst [1] : vector<8x256xf32> to vector<8xf32>
    %2 = vector.shape_cast %1 : vector<8xf32> to vector<8x1xf32>
    %cst_1 = arith.constant dense<0.000000e+00> : vector<8xf32>
    %3 = vector.multi_reduction <add>, %0, %cst_1 [1] : vector<8x256xf32> to vector<8xf32>
    %4 = vector.shape_cast %3 : vector<8xf32> to vector<8x1xf32>
    %cst_2 = arith.constant 3.906250e-03 : f32
    %5 = vector.broadcast %cst_2 : f32 to vector<8x1xf32>
    %6 = arith.mulf %4, %5 : vector<8x1xf32>
    %7 = arith.addf %2, %6 : vector<8x1xf32>
    %c0_3 = arith.constant 0 : index
    %c0_4 = arith.constant 0 : index
    %8 = vector.load %arg2[%c0_3, %c0_4] : memref<8x1xf32, #tpu.memory_space<vmem>>, vector<8x1xf32>
    tpu.vector_store %arg2[%c0_3, %c0_4], %7 {strides = array<i32>} : memref<8x1xf32, #tpu.memory_space<vmem>>, vector<8x1xf32>,
    return
  }
  func.func @transform_0(%arg0: i32) -> (i32, i32) {
    %c0_i32 = arith.constant 0 : i32
    %c0_i32_0 = arith.constant 0 : i32
    return %arg0, %c0_i32 : i32, i32
  }
  func.func @transform_1(%arg0: i32) -> (i32, i32) {
    %c0_i32 = arith.constant 0 : i32
    %c0_i32_0 = arith.constant 0 : i32
    return %arg0, %c0_i32 : i32, i32
  }
}

</mosaic_0001>

<bundles_post_ra>
// kernel: tpu_custom_call.1
= control target key start
LH: loop header
LB: loop body
LE: loop exit
PB: predicated region body
PF: predicated region fallthrough
CT: control target
= control target key end

     0   :  { %6 = vsyncpa [#allocation3], 0  ;;  %s66_s9 = smov [#allocation2]   ;;  %s83_s0 = inlined_call_operand.hbm [shape: f32[8,256], index: 0, kind: input, shape index: {}]   ;;  %s84_s1 = inlined_call_operand.vmem [shape: f32[8,1], index: 1, kind: output, shape index: {}]  }
   0x1   :  { %s12_s8 = sshll.u32 %s83_s0, 4  ;;  %s14_s10 = sshll.u32 %s66_s9, 4  ;;  %s13_s8 = int_to_ptr.hbm [resolvable:$true] %s12_s8  ;;  %s15_s10 = int_to_ptr.vmem [resolvable:$true] %s14_s10 }
   0x2   :  { %17 = dma.hbm_to_vmem [thread:$0]  %s13_s8, 256, %s15_s10, [#allocation3]  }
   0x3   :  { %64 = dma.done.wait [#allocation3], 256  }
   0x4   :  { %65 = vsyncadd [#allocation3], 4294967040  ;;  %v22_v0 = vld [vmem:[#allocation2] sm:$0xff]  ;;  %v23_v1 = vld [vmem:[#allocation2 + $0x8] sm:$0xff]  ;;  %vm32_vm0 = vcmask 7168  }
   0x5   :  { %v27_v2 = vadd.f32 %v23_v1, %v22_v0  ;;  %v24_v3 = vmax.f32 %v22_v0, %v23_v1 }
   0x7   :  { %28 = vadd.xlane.f32.xlu0 %v27_v2 }
   0xf   :  { %25 = vmax.xlane.f32.xlu0 %v24_v3 }
  0x7a   :  { %v29_v4 = vpop.xlane.xlu0 %28 }
  0x7b   :  { %v30_v5 = vmul.f32 0.00390625, %v29_v4 }
  0x82   :  { %v26_v6 = vpop.xlane.xlu0 %25 }
  0x83   :  { %v31_v7 = vadd.f32 %v30_v5, %v26_v6 }
  0x85   :  { %33 = vst.msk [vmem:[%s84_s1] sm:$0xff] %vm32_vm0, %v31_v7 }
  0x86   :  { %38 = vsyncpa [#allocation3], 1 }

</bundles_post_ra>
